<compile_context>
chip_gen: v5e
topology: v5e:2x2
jax: 0.10.0
libtpu: 0.0.40
codegen_flags: <defaults>
</compile_context>

<pallas_src>
import functools

import jax
import jax.numpy as jnp
from jax import lax
from jax.experimental import pallas as pl
from jax.experimental.pallas import tpu as pltpu

_LANE = 128        # vreg lane width: hidden padded to a multiple of this
_TOK_TILE = 128    # tokens per grid step (both paths)


def _round_up(x, m):
    return (x + m - 1) // m * m


def _vmem_capacity_bytes():
    try:
        return int(pltpu.get_tpu_info().vmem_capacity_bytes)
    except Exception:
        return 64 << 20        # conservative fallback: v7x per-core VMEM


def _default_vocab_chunk():
    # v5e MXU is 4x128x128 -> 128-wide contraction chunks keep vreg pressure
    # down; v6e/v7x MXU native K is 256.
    try:
        kind = jax.devices()[0].device_kind.lower()
        if "v5 lite" in kind or "v5e" in kind or "v5lite" in kind:
            return 128
    except Exception:
        pass
    return 256


# ---------------------------------------------------------------------------
# Path 1: VMEM-resident table + MXU one-hot matmul
# ---------------------------------------------------------------------------
def _onehot_kernel(idx_ref, w_ref, out_ref, *, vocab_chunk):
    # idx_ref: (TN, 1)        int32 token ids (padded slots hold -1)
    # w_ref:   (v_pad, h_pad) table, constant block index -> DMA'd once
    # out_ref: (TN, h_pad)    f32
    tn = idx_ref.shape[0]
    v_pad, h_pad = w_ref.shape
    tv = vocab_chunk
    n_chunks = v_pad // tv

    idx = idx_ref[...]                                        # (TN, 1)
    iota = lax.broadcasted_iota(jnp.int32, (tn, tv), 1)       # (TN, TV)

    def chunk_dot(k_start, acc):
        one_hot = (iota == (idx - k_start)).astype(w_ref.dtype)   # exact 0/1
        return acc + jnp.dot(one_hot, w_ref[pl.ds(k_start, tv), :],
                             preferred_element_type=jnp.float32)

    acc = jnp.zeros((tn, h_pad), jnp.float32)
    if n_chunks <= 8:
        for k in range(n_chunks):                  # static, fully unrolled
            acc = chunk_dot(k * tv, acc)
    else:
        acc = lax.fori_loop(
            0, n_chunks,
            lambda k, a: chunk_dot(pl.multiple_of(k * tv, tv), a),
            acc)
    out_ref[...] = acc.astype(out_ref.dtype)


# ---------------------------------------------------------------------------
# Path 2: batched DMA row gather, table stays in HBM
# ---------------------------------------------------------------------------
def _gather_kernel(ids_smem, idv_ref, w_hbm, out_ref, buf, sem):
    # ids_smem: (n_pad,)       int32 in SMEM (scalar prefetch) -> DMA row ids
    # idv_ref:  (T, 1)         int32 VMEM block (vectorized validity mask)
    # w_hbm:    (v_pad, h_pad) table left in HBM (memory_space=pl.ANY)
    # out_ref:  (T, h_pad)     f32 output block
    # buf:      (T, h_pad)     VMEM scratch (table dtype)
    # sem:      (1,)           DMA semaphore shared by the T row copies
    t_tok, h_pad = buf.shape
    v_pad = w_hbm.shape[0]
    base = pl.program_id(0) * t_tok

    # Issue T concurrent single-row DMAs (clamped for HBM safety).
    @pl.loop(0, t_tok)
    def _(t):
        row = jnp.maximum(jnp.minimum(ids_smem[base + t], v_pad - 1), 0)
        pltpu.make_async_copy(w_hbm.at[pl.ds(row, 1), :],
                              buf.at[pl.ds(t, 1), :],
                              sem.at[0]).start()

    # One wait per issued copy; descriptor shape matches the issued shape, so
    # this is consistent whether the DMA sem counts copies or bytes.
    @pl.loop(0, t_tok)
    def _(t):
        pltpu.make_async_copy(w_hbm.at[pl.ds(0, 1), :],
                              buf.at[pl.ds(0, 1), :],
                              sem.at[0]).wait()

    ids = idv_ref[...]                                        # (T, 1)
    valid = jnp.logical_and(ids >= 0, ids < v_pad)
    out_ref[...] = jnp.where(valid, buf[...].astype(jnp.float32), 0.0)


# ---------------------------------------------------------------------------
# Module wrapper (== EncoderRNN): padding of the table is hoisted to __init__
# ---------------------------------------------------------------------------
class EncoderRNNPallas:
    """Pallas equivalent of EncoderRNN.forward: embedding lookup only."""

    def __init__(self, weight, *, table_dtype=jnp.float32,
                 tokens_per_tile=_TOK_TILE, vocab_chunk=None):
        v, h = weight.shape
        self.vocab_size = int(v)
        self.hidden_size = int(h)
        self.tokens_per_tile = int(tokens_per_tile)
        self.h_pad = _round_up(max(h, _LANE), _LANE)
        self.v_pad = _round_up(max(v, 256), 256)
        self.vocab_chunk = int(vocab_chunk) if vocab_chunk else _default_vocab_chunk()
        self.vocab_chunk = min(self.vocab_chunk, self.v_pad)
        assert self.v_pad % self.vocab_chunk == 0
        self.table_dtype = table_dtype

        # Pad the table ONCE (not per forward call): zero rows/cols so padded
        # vocab rows embed to zero and padded hidden lanes are zero.
        w_pad = jnp.zeros((self.v_pad, self.h_pad), dtype=table_dtype)
        self.w_pad = w_pad.at[:v, :h].set(weight.astype(table_dtype))

        itemsize = jnp.dtype(table_dtype).itemsize
        self.table_bytes = self.v_pad * self.h_pad * itemsize
        self.vmem_cap = _vmem_capacity_bytes()
        # Resident-table budget: ~half of VMEM minus headroom (covers the
        # default double-buffered table allocation plus working tiles).
        self.resident_budget = max(self.vmem_cap // 2 - (8 << 20), 16 << 20)

    # ---- path 1 -----------------------------------------------------------
    def _forward_onehot(self, ids_pad):
        n_pad = ids_pad.shape[0]
        tn = self.tokens_per_tile
        idx2 = ids_pad.reshape(n_pad, 1)

        need = (2 * self.table_bytes                    # resident table (x2 bufs)
                + 2 * tn * self.h_pad * 4               # output blocks
                + 2 * tn * self.vocab_chunk * 4         # one-hot intermediates
                + 2 * tn * 4 + (4 << 20))
        vmem_limit = int(min(max(need, 8 << 20), self.vmem_cap - (8 << 20)))

        cost = pl.CostEstimate(
            flops=2 * n_pad * self.v_pad * self.h_pad,
            transcendentals=0,
            bytes_accessed=int(n_pad * 4 + self.table_bytes
                               + n_pad * self.h_pad * 4))

        kernel = functools.partial(_onehot_kernel, vocab_chunk=self.vocab_chunk)
        return pl.pallas_call(
            kernel,
            out_shape=jax.ShapeDtypeStruct((n_pad, self.h_pad), jnp.float32),
            grid_spec=pltpu.PrefetchScalarGridSpec(
                num_scalar_prefetch=0,
                grid=(n_pad // tn,),
                in_specs=[
                    pl.BlockSpec((tn, 1), lambda i: (i, 0)),
                    # constant block index -> fetched once, stays resident
                    pl.BlockSpec((self.v_pad, self.h_pad), lambda i: (0, 0)),
                ],
                out_specs=pl.BlockSpec((tn, self.h_pad), lambda i: (i, 0)),
            ),
            compiler_params=pltpu.CompilerParams(
                dimension_semantics=("parallel",),
                vmem_limit_bytes=vmem_limit),
            cost_estimate=cost,
        )(idx2, self.w_pad)

    # ---- path 2 -----------------------------------------------------------
    def _forward_gather(self, ids_pad):
        # TODO(synk): chunk the call over tokens if b*s reaches the hundreds
        # of thousands (SMEM id-table capacity for the scalar prefetch).
        n_pad = ids_pad.shape[0]
        tt = self.tokens_per_tile
        idx2 = ids_pad.reshape(n_pad, 1)
        itemsize = jnp.dtype(self.table_dtype).itemsize

        cost = pl.CostEstimate(
            flops=0, transcendentals=0,
            bytes_accessed=int(n_pad * 8 + n_pad * self.h_pad * (itemsize + 4)))

        return pl.pallas_call(
            _gather_kernel,
            out_shape=jax.ShapeDtypeStruct((n_pad, self.h_pad), jnp.float32),
            grid_spec=pltpu.PrefetchScalarGridSpec(
                num_scalar_prefetch=1,
                grid=(n_pad // tt,),
                in_specs=[
                    pl.BlockSpec((tt, 1), lambda i, ids: (i, 0)),
                    pl.BlockSpec(memory_space=pl.ANY),    # table stays in HBM
                ],
                out_specs=pl.BlockSpec((tt, self.h_pad), lambda i, ids: (i, 0)),
                scratch_shapes=[
                    pltpu.VMEM((tt, self.h_pad), self.table_dtype),
                    pltpu.SemaphoreType.DMA((1,)),
                ],
            ),
            compiler_params=pltpu.CompilerParams(
                dimension_semantics=("parallel",)),
            cost_estimate=cost,
        )(ids_pad, idx2, self.w_pad)

    # ---- forward ----------------------------------------------------------
    def __call__(self, input_ids, method="auto"):
        b, s = input_ids.shape
        n = b * s
        n_pad = _round_up(max(n, self.tokens_per_tile), self.tokens_per_tile)
        ids = input_ids.reshape(n).astype(jnp.int32)
        ids_pad = jnp.full((n_pad,), -1, dtype=jnp.int32).at[:n].set(ids)

        if method == "auto":
            # onehot only while the (double-buffered) table fits VMEM-resident;
            # otherwise the batched DMA gather moves only O(N*H) bytes.
            method = ("onehot" if 2 * self.table_bytes <= self.resident_budget
                      else "gather")

        if method == "onehot":
            out = self._forward_onehot(ids_pad)
        elif method == "gather":
            out = self._forward_gather(ids_pad)
        else:
            raise ValueError(f"unknown method: {method}")

        return out[:n, :self.hidden_size].reshape(b, s, self.hidden_size)


def init_embedding(key, input_size, hidden_size, padding_idx=2):
    # nn.Embedding default init: N(0, 1); padding_idx row is zeroed.
    w = jax.random.normal(key, (input_size, hidden_size), dtype=jnp.float32)
    w = w.at[padding_idx].set(0.0)
    return w


if __name__ == "__main__":
    key = jax.random.PRNGKey(0)
    k_w, k_idx = jax.random.split(key)

    input_size = 64    # vocab size
    hidden_size = 32
    batch_size = 2
    seq_len = 8

    weight = init_embedding(k_w, input_size, hidden_size, padding_idx=2)
    input_ids = jax.random.randint(
        k_idx, (batch_size, seq_len), 0, input_size, dtype=jnp.int32)
    input_ids = input_ids.at[0, 0].set(2)   # ensure padding index appears

    ref = jnp.take(weight, input_ids, axis=0)

    enc = EncoderRNNPallas(weight)   # table padded ONCE here

    # VMEM-resident one-hot MXU path (the small-vocab "auto" choice)
    out_mm = jax.block_until_ready(enc(input_ids, method="onehot"))
    assert out_mm.shape == (batch_size, seq_len, hidden_size)
    assert jnp.allclose(out_mm, ref, atol=1e-5), "onehot path mismatch"
    assert jnp.allclose(out_mm[0, 0], 0.0), "padding_idx row must be zero"

    # Batched HBM row-gather path (large-vocab path, exercised here too)
    out_g = jax.block_until_ready(enc(input_ids, method="gather"))
    assert out_g.shape == (batch_size, seq_len, hidden_size)
    assert jnp.allclose(out_g, ref, atol=1e-5), "gather path mismatch"
    assert jnp.allclose(out_g[0, 0], 0.0), "padding_idx row must be zero"

    # auto heuristic picks the resident onehot for this tiny table
    out_auto = jax.block_until_ready(enc(input_ids))
    assert jnp.allclose(out_auto, ref, atol=1e-5), "auto path mismatch"

    print("KERNEL_OK")
</pallas_src>

<mosaic_0001>
module attributes {stable_mosaic.version = 11 : i64} {
  func.func @_onehot_kernel(%arg0: i32, %arg1: memref<128x1xi32, #tpu.memory_space<vmem>>, %arg2: memref<256x128xf32, #tpu.memory_space<vmem>>, %arg3: memref<128x128xf32, #tpu.memory_space<vmem>>) attributes {dimension_semantics = [#tpu.dimension_semantics<parallel>], iteration_bounds = array<i64: 1>, scalar_prefetch = 0 : i64, scratch_operands = 0 : i64, tpu.core_type = #tpu.core_type<tc>, window_params = [{transform_indices = @transform_0, window_bounds = array<i64: 128, 1>}, {pipeline_mode = #tpu.pipeline_mode<synchronous>, transform_indices = @transform_1, window_bounds = array<i64: 256, 128>}, {transform_indices = @transform_2, window_bounds = array<i64: 128, 128>}]} {
    %c0 = arith.constant 0 : index
    %c0_0 = arith.constant 0 : index
    %0 = vector.load %arg1[%c0, %c0_0] : memref<128x1xi32, #tpu.memory_space<vmem>>, vector<128x1xi32>
    %1 = tpu.iota {dimensions = array<i32: 1>} : vector<128x256xi32>
    %cst = arith.constant 0.000000e+00 : f32
    %2 = vector.broadcast %cst : f32 to vector<128x128xf32>
    %c0_i32 = arith.constant 0 : i32
    %3 = vector.broadcast %c0_i32 : i32 to vector<128x1xi32>
    %4 = arith.subi %0, %3 : vector<128x1xi32>
    %5 = vector.broadcast %4 : vector<128x1xi32> to vector<128x256xi32>
    %6 = arith.cmpi eq, %1, %5 : vector<128x256xi32>
    %7 = arith.extui %6 : vector<128x256xi1> to vector<128x256xi32>
    %8 = arith.sitofp %7 : vector<128x256xi32> to vector<128x256xf32>
    %c0_1 = arith.constant 0 : index
    %c0_2 = arith.constant 0 : index
    %9 = vector.load %arg2[%c0_1, %c0_2] : memref<256x128xf32, #tpu.memory_space<vmem>>, vector<256x128xf32>
    %cst_3 = arith.constant dense<0.000000e+00> : vector<128x128xf32>
    %10 = tpu.matmul %8, %9, %cst_3 {dimension_numbers = #tpu.dot_dimension_numbers<[1], [0], [0], [1], [0, 0, 1, 1], [], []>} : vector<128x256xf32>, vector<256x128xf32>, vector<128x128xf32> -> vector<128x128xf32>
    %11 = arith.addf %2, %10 : vector<128x128xf32>
    %c0_4 = arith.constant 0 : index
    %c0_5 = arith.constant 0 : index
    %12 = vector.load %arg3[%c0_4, %c0_5] : memref<128x128xf32, #tpu.memory_space<vmem>>, vector<128x128xf32>
    tpu.vector_store %arg3[%c0_4, %c0_5], %11 {strides = array<i32>} : memref<128x128xf32, #tpu.memory_space<vmem>>, vector<128x128xf32>,
    return
  }
  func.func @transform_0(%arg0: i32) -> (i32, i32) {
    %c0_i32 = arith.constant 0 : i32
    %c0_i32_0 = arith.constant 0 : i32
    return %arg0, %c0_i32 : i32, i32
  }
  func.func @transform_1(%arg0: i32) -> (i32, i32) {
    %c0_i32 = arith.constant 0 : i32
    %c0_i32_0 = arith.constant 0 : i32
    %c0_i32_1 = arith.constant 0 : i32
    return %c0_i32, %c0_i32_0 : i32, i32
  }
  func.func @transform_2(%arg0: i32) -> (i32, i32) {
    %c0_i32 = arith.constant 0 : i32
    %c0_i32_0 = arith.constant 0 : i32
    return %arg0, %c0_i32 : i32, i32
  }
}

</mosaic_0001>

<bundles_post_ra>
// kernel: tpu_custom_call.1
= control target key start
LH: loop header
LB: loop body
LE: loop exit
PB: predicated region body
PF: predicated region fallthrough
CT: control target
= control target key end

     0   :  { %7 = vsyncpa [#allocation3], 0  ;;  %s695_s0 = inlined_call_operand.vmem [shape: s32[128,1], index: 0, kind: input, shape index: {}]   ;;  %s696_s1 = inlined_call_operand.hbm [shape: f32[256,128], index: 1, kind: input, shape index: {}]   ;;  %s697_s2 = inlined_call_operand.hbm [shape: f32[128,128], index: 2, kind: output, shape index: {}]  }
   0x1   :  { %8 = vsyncpa [#allocation4], 0  ;;  %s15_s11 = sshll.u32 %s696_s1, 4  ;;  %s545_s12 = smov [#allocation2]   ;;  %s16_s11 = int_to_ptr.hbm [resolvable:$true] %s15_s11 }
   0x2   :  { %s17_s13 = sshll.u32 %s545_s12, 4  ;;  %s546_s14 = smov 128   ;;  %s18_s13 = int_to_ptr.vmem [resolvable:$true] %s17_s13 }
   0x3   :  { %s547_s15 = smov 8  }
   0x4   :  { %23 = dma.hbm_to_vmem [thread:$0]  %s16_s11, 4096, %s18_s13, [#allocation3], %s546_s14, %s546_s14, %s547_s15  }
   0x5   :  { %541 = dma.done.wait [#allocation3], 4096  }
   0x6   :  { %542 = vsyncadd [#allocation3], 4294963200  ;;  %v548_v0 = vmov 0   ;;  %v37_v1 = vld [vmem:[%s695_s0 + $0x48] sm:$0xff]  ;;  %v36_v2 = vld [vmem:[%s695_s0 + $0x40] sm:$0xff]  ;;  %v44_v49 = vlaneseq  ;;  %v549_v53 = vmov 1.0  }
   0x7   :  { %491 = vset.pattern.permute.xlu1 %v548_v0  ;;  %490 = vset.pattern.permute.xlu0 %v548_v0  ;;  %v38_v3 = vld [vmem:[%s695_s0 + $0x50] sm:$0xff]  ;;  %v29_v4 = vld [vmem:[%s695_s0 + $0x8] sm:$0xff]  ;;  %v28_v5 = vld [vmem:[%s695_s0] sm:$0xff]  ;;  %s375_s23 = sshll.u32 %s697_s2, 4  ;;  %s376_s23 = int_to_ptr.hbm [resolvable:$true] %s375_s23 }
   0x8   :  { %492 = vset.pattern.permute.xlu2 %v548_v0  ;;  %75 = vperm.xlu1 %491, %v37_v1   ;;  %v30_v6 = vld [vmem:[%s695_s0 + $0x10] sm:$0xff]  ;;  %v206_v7 = vld [vmem:[#allocation2 + $0x78] sm:$0xff]  ;;  %v204_v11 = vld [vmem:[#allocation2 + $0x68] sm:$0xff]  ;;  %v620_v50 = vand.u32 127, %v44_v49 }
   0x9   :  { %72 = vperm.xlu0 %490, %v36_v2   ;;  %78 = vperm.xlu2 %492, %v38_v3   ;;  %v222_v8 = vld [vmem:[#allocation2 + $0xf8] sm:$0xff]  ;;  %v205_v9 = vld [vmem:[#allocation2 + $0x70] sm:$0xff]  ;;  %v220_v12 = vld [vmem:[#allocation2 + $0xe8] sm:$0xff] }
   0xa   :  { %452 = vmatpush.msra.mxu2 %v206_v7  ;;  %v221_v10 = vld [vmem:[#allocation2 + $0xf0] sm:$0xff]  ;;  %468 = vmatpush.msra.mxu3 %v222_v8  ;;  %v203_v13 = vld [vmem:[#allocation2 + $0x60] sm:$0xff]  ;;  %v31_v14 = vld [vmem:[%s695_s0 + $0x18] sm:$0xff]  ;;  %v623_v51 = vadd.s32 128, %v620_v50 }
   0xb   :  { %223 = vmatpush.msra.mxu0 %v206_v7  ;;  %288 = vmatpush.msra.mxu1 %v222_v8  ;;  %v39_v15 = vld [vmem:[%s695_s0 + $0x58] sm:$0xff]  ;;  %v40_v16 = vld [vmem:[%s695_s0 + $0x60] sm:$0xff]  ;;  %v201_v20 = vld [vmem:[#allocation2 + $0x50] sm:$0xff] }
   0xc   :  { %453 = vmatpush.msra.mxu2 %v205_v9  ;;  %469 = vmatpush.msra.mxu3 %v221_v10  ;;  %v219_v17 = vld [vmem:[#allocation2 + $0xe0] sm:$0xff]  ;;  %v202_v18 = vld [vmem:[#allocation2 + $0x58] sm:$0xff]  ;;  %v217_v21 = vld [vmem:[#allocation2 + $0xd0] sm:$0xff] }
   0xd   :  { %224 = vmatpush.msra.mxu0 %v205_v9  ;;  %289 = vmatpush.msra.mxu1 %v221_v10  ;;  %v218_v19 = vld [vmem:[#allocation2 + $0xd8] sm:$0xff]  ;;  %v200_v22 = vld [vmem:[#allocation2 + $0x48] sm:$0xff]  ;;  %v32_v25 = vld [vmem:[%s695_s0 + $0x20] sm:$0xff] }
   0xe   :  { %454 = vmatpush.msra.mxu2 %v204_v11  ;;  %470 = vmatpush.msra.mxu3 %v220_v12  ;;  %v216_v23 = vld [vmem:[#allocation2 + $0xc8] sm:$0xff]  ;;  %v34_v27 = vld [vmem:[%s695_s0 + $0x30] sm:$0xff]  ;;  %v43_v29 = vld [vmem:[%s695_s0 + $0x78] sm:$0xff] }
   0xf   :  { %225 = vmatpush.msra.mxu0 %v204_v11  ;;  %290 = vmatpush.msra.mxu1 %v220_v12  ;;  %v41_v24 = vld [vmem:[%s695_s0 + $0x68] sm:$0xff]  ;;  %v42_v28 = vld [vmem:[%s695_s0 + $0x70] sm:$0xff]  ;;  %v35_v30 = vld [vmem:[%s695_s0 + $0x38] sm:$0xff] }
  0x10   :  { %51 = vperm.xlu1 %491, %v29_v4   ;;  %455 = vmatpush.msra.mxu2 %v203_v13  ;;  %v33_v26 = vld [vmem:[%s695_s0 + $0x28] sm:$0xff]  ;;  %v199_v31 = vld [vmem:[#allocation2 + $0x40] sm:$0xff]  ;;  %v198_v33 = vld [vmem:[#allocation2 + $0x38] sm:$0xff]  ;;  %s550_s0 = smov [#allocation5]  }
  0x11   :  { %48 = vperm.xlu0 %490, %v28_v5   ;;  %54 = vperm.xlu2 %492, %v30_v6   ;;  %v215_v32 = vld [vmem:[#allocation2 + $0xc0] sm:$0xff]  ;;  %v214_v34 = vld [vmem:[#allocation2 + $0xb8] sm:$0xff]  ;;  %v197_v35 = vld [vmem:[#allocation2 + $0x30] sm:$0xff]  ;;  %s373_s20 = sshll.u32 %s550_s0, 4  ;;  %s374_s20 = int_to_ptr.vmem [resolvable:$true] %s373_s20 }
  0x12   :  { %471 = vmatpush.msra.mxu3 %v219_v17  ;;  %456 = vmatpush.msra.mxu2 %v202_v18  ;;  %v213_v36 = vld [vmem:[#allocation2 + $0xb0] sm:$0xff]  ;;  %v196_v37 = vld [vmem:[#allocation2 + $0x28] sm:$0xff]  ;;  %v195_v39 = vld [vmem:[#allocation2 + $0x20] sm:$0xff] }
  0x13   :  { %226 = vmatpush.msra.mxu0 %v203_v13  ;;  %291 = vmatpush.msra.mxu1 %v219_v17  ;;  %v212_v38 = vld [vmem:[#allocation2 + $0xa8] sm:$0xff]  ;;  %v211_v40 = vld [vmem:[#allocation2 + $0xa0] sm:$0xff]  ;;  %v194_v41 = vld [vmem:[#allocation2 + $0x18] sm:$0xff] }
  0x14   :  { %472 = vmatpush.msra.mxu3 %v218_v19  ;;  %457 = vmatpush.msra.mxu2 %v201_v20  ;;  %v210_v42 = vld [vmem:[#allocation2 + $0x98] sm:$0xff]  ;;  %v193_v43 = vld [vmem:[#allocation2 + $0x10] sm:$0xff]  ;;  %v192_v45 = vld [vmem:[#allocation2 + $0x8] sm:$0xff] }
  0x15   :  { %227 = vmatpush.msra.mxu0 %v202_v18  ;;  %292 = vmatpush.msra.mxu1 %v218_v19  ;;  %v209_v44 = vld [vmem:[#allocation2 + $0x90] sm:$0xff]  ;;  %v208_v46 = vld [vmem:[#allocation2 + $0x88] sm:$0xff]  ;;  %v191_v47 = vld [vmem:[#allocation2] sm:$0xff] }
  0x16   :  { %473 = vmatpush.msra.mxu3 %v217_v21  ;;  %458 = vmatpush.msra.mxu2 %v200_v22  ;;  %v207_v48 = vld [vmem:[#allocation2 + $0x80] sm:$0xff] }
  0x17   :  { %228 = vmatpush.msra.mxu0 %v201_v20  ;;  %293 = vmatpush.msra.mxu1 %v217_v21 }
  0x18   :  { %57 = vperm.xlu1 %491, %v31_v14   ;;  %474 = vmatpush.msra.mxu3 %v216_v23 }
  0x19   :  { %81 = vperm.xlu0 %490, %v39_v15   ;;  %84 = vperm.xlu2 %492, %v40_v16  }
  0x1a   :  { %229 = vmatpush.msra.mxu0 %v200_v22  ;;  %294 = vmatpush.msra.mxu1 %v216_v23 }
  0x1b   :  { %459 = vmatpush.msra.mxu2 %v199_v31  ;;  %475 = vmatpush.msra.mxu3 %v215_v32 }
  0x1c   :  { %230 = vmatpush.msra.mxu0 %v199_v31  ;;  %295 = vmatpush.msra.mxu1 %v215_v32 }
  0x1d   :  { %460 = vmatpush.msra.mxu2 %v198_v33  ;;  %476 = vmatpush.msra.mxu3 %v214_v34 }
  0x1e   :  { %231 = vmatpush.msra.mxu0 %v198_v33  ;;  %296 = vmatpush.msra.mxu1 %v214_v34 }
  0x1f   :  { %461 = vmatpush.msra.mxu2 %v197_v35  ;;  %477 = vmatpush.msra.mxu3 %v213_v36 }
  0x20   :  { %87 = vperm.xlu1 %491, %v41_v24   ;;  %232 = vmatpush.msra.mxu0 %v197_v35 }
  0x21   :  { %60 = vperm.xlu0 %490, %v32_v25   ;;  %63 = vperm.xlu2 %492, %v33_v26  }
  0x22   :  { %297 = vmatpush.msra.mxu1 %v213_v36  ;;  %462 = vmatpush.msra.mxu2 %v196_v37 }
  0x23   :  { %478 = vmatpush.msra.mxu3 %v212_v38  ;;  %233 = vmatpush.msra.mxu0 %v196_v37 }
  0x24   :  { %298 = vmatpush.msra.mxu1 %v212_v38  ;;  %463 = vmatpush.msra.mxu2 %v195_v39 }
  0x25   :  { %479 = vmatpush.msra.mxu3 %v211_v40  ;;  %234 = vmatpush.msra.mxu0 %v195_v39 }
  0x26   :  { %299 = vmatpush.msra.mxu1 %v211_v40  ;;  %464 = vmatpush.msra.mxu2 %v194_v41 }
  0x27   :  { %480 = vmatpush.msra.mxu3 %v210_v42  ;;  %235 = vmatpush.msra.mxu0 %v194_v41 }
  0x28   :  { %66 = vperm.xlu1 %491, %v34_v27   ;;  %300 = vmatpush.msra.mxu1 %v210_v42 }
  0x29   :  { %90 = vperm.xlu0 %490, %v42_v28   ;;  %93 = vperm.xlu2 %492, %v43_v29  }
  0x2a   :  { %465 = vmatpush.msra.mxu2 %v193_v43  ;;  %481 = vmatpush.msra.mxu3 %v209_v44 }
  0x2b   :  { %236 = vmatpush.msra.mxu0 %v193_v43  ;;  %301 = vmatpush.msra.mxu1 %v209_v44 }
  0x2c   :  { %466 = vmatpush.msra.mxu2 %v192_v45  ;;  %482 = vmatpush.msra.mxu3 %v208_v46 }
  0x2d   :  { %237 = vmatpush.msra.mxu0 %v192_v45  ;;  %302 = vmatpush.msra.mxu1 %v208_v46 }
  0x2e   :  { %467 = vmatpush.msra.mxu2 %v191_v47  ;;  %483 = vmatpush.msra.mxu3 %v207_v48 }
  0x2f   :  { %238 = vmatpush.msra.mxu0 %v191_v47  ;;  %303 = vmatpush.msra.mxu1 %v207_v48 }
  0x31   :  { %69 = vperm.xlu0 %490, %v35_v30  }
  0x63   :  { %v79_v56 = vpop.permute.xlu2 %78 }
  0x64   :  { %vm115_vm6 = vcmp.eq.s32.totalorder %v620_v50, %v79_v56  ;;  %vm116_vm7 = vcmp.eq.s32.totalorder %v623_v51, %v79_v56 }
  0x6b   :  { %v55_v58 = vpop.permute.xlu2 %54 }
  0x6c   :  { %vm99_vm10 = vcmp.eq.s32.totalorder %v620_v50, %v55_v58  ;;  %vm100_vm12 = vcmp.eq.s32.totalorder %v623_v51, %v55_v58 }
  0x73   :  { %v85_v61 = vpop.permute.xlu2 %84 }
  0x74   :  { %vm119_vm15 = vcmp.eq.s32.totalorder %v620_v50, %v85_v61 }
  0x7a   :  { %v76_v54 = vpop.permute.xlu1 %75 }
  0x7b   :  { %v73_v52 = vpop.permute.xlu0 %72  ;;  %vm113_vm2 = vcmp.eq.s32.totalorder %v620_v50, %v76_v54  ;;  %vm114_vm3 = vcmp.eq.s32.totalorder %v623_v51, %v76_v54  ;;  %v64_v0 = vpop.permute.xlu2 %63 }
  0x7c   :  { %vm111_vm0 = vcmp.eq.s32.totalorder %v620_v50, %v73_v52  ;;  %vm112_vm1 = vcmp.eq.s32.totalorder %v623_v51, %v73_v52 }
  0x7d   :  { %428 = vmatmul.msk.f32.vlgmr.msra.gmra.mxu2 %vm111_vm0, %v549_v53  ;;  %444 = vmatmul.msk.f32.vlgmr.msra.gmra.mxu3 %vm112_vm1, %v549_v53  ;;  %vm120_vm1 = vcmp.eq.s32.totalorder %v623_v51, %v85_v61 }
  0x82   :  { %v52_v57 = vpop.permute.xlu1 %51 }
  0x83   :  { %v49_v55 = vpop.permute.xlu0 %48  ;;  %vm97_vm8 = vcmp.eq.s32.totalorder %v620_v50, %v52_v57  ;;  %vm98_vm9 = vcmp.eq.s32.totalorder %v623_v51, %v52_v57  ;;  %v94_v2 = vpop.permute.xlu2 %93 }
  0x84   :  { %vm95_vm4 = vcmp.eq.s32.totalorder %v620_v50, %v49_v55  ;;  %vm96_vm5 = vcmp.eq.s32.totalorder %v623_v51, %v49_v55 }
  0x85   :  { %420 = vmatmul.msk.f32.vlgmr.msra.gmra.mxu0 %vm95_vm4, %v549_v53  ;;  %429 = vmatmul.msk.f32.gmra.mxu2 %vm113_vm2, %v549_v53 }
  0x86   :  { %436 = vmatmul.msk.f32.vlgmr.msra.gmra.mxu1 %vm96_vm5, %v549_v53  ;;  %445 = vmatmul.msk.f32.gmra.mxu3 %vm114_vm3, %v549_v53 }
  0x8a   :  { %v58_v60 = vpop.permute.xlu1 %57 }
  0x8b   :  { %v82_v59 = vpop.permute.xlu0 %81  ;;  %vm101_vm14 = vcmp.eq.s32.totalorder %v620_v50, %v58_v60  ;;  %vm102_vm0 = vcmp.eq.s32.totalorder %v623_v51, %v58_v60 }
  0x8c   :  { %vm117_vm11 = vcmp.eq.s32.totalorder %v620_v50, %v82_v59  ;;  %vm118_vm13 = vcmp.eq.s32.totalorder %v623_v51, %v82_v59 }
  0x8d   :  { %421 = vmatmul.msk.f32.gmra.mxu0 %vm97_vm8, %v549_v53  ;;  %430 = vmatmul.msk.f32.gmra.mxu2 %vm115_vm6, %v549_v53  ;;  %vm105_vm6 = vcmp.eq.s32.totalorder %v620_v50, %v64_v0  ;;  %vm106_vm8 = vcmp.eq.s32.totalorder %v623_v51, %v64_v0 }
  0x8e   :  { %437 = vmatmul.msk.f32.gmra.mxu1 %vm98_vm9, %v549_v53  ;;  %446 = vmatmul.msk.f32.gmra.mxu3 %vm116_vm7, %v549_v53 }
  0x92   :  { %v88_v63 = vpop.permute.xlu1 %87 }
  0x93   :  { %v61_v62 = vpop.permute.xlu0 %60  ;;  %vm121_vm3 = vcmp.eq.s32.totalorder %v620_v50, %v88_v63  ;;  %vm122_vm5 = vcmp.eq.s32.totalorder %v623_v51, %v88_v63 }
  0x94   :  { %vm103_vm2 = vcmp.eq.s32.totalorder %v620_v50, %v61_v62  ;;  %vm104_vm4 = vcmp.eq.s32.totalorder %v623_v51, %v61_v62 }
  0x95   :  { %422 = vmatmul.msk.f32.gmra.mxu0 %vm99_vm10, %v549_v53  ;;  %431 = vmatmul.msk.f32.gmra.mxu2 %vm117_vm11, %v549_v53  ;;  %vm125_vm10 = vcmp.eq.s32.totalorder %v620_v50, %v94_v2 }
  0x96   :  { %438 = vmatmul.msk.f32.gmra.mxu1 %vm100_vm12, %v549_v53  ;;  %447 = vmatmul.msk.f32.gmra.mxu3 %vm118_vm13, %v549_v53  ;;  %vm126_vm12 = vcmp.eq.s32.totalorder %v623_v51, %v94_v2 }
  0x9a   :  { %v67_v3 = vpop.permute.xlu1 %66 }
  0x9b   :  { %v91_v1 = vpop.permute.xlu0 %90  ;;  %vm107_vm11 = vcmp.eq.s32.totalorder %v620_v50, %v67_v3  ;;  %vm108_vm13 = vcmp.eq.s32.totalorder %v623_v51, %v67_v3 }
  0x9c   :  { %vm123_vm7 = vcmp.eq.s32.totalorder %v620_v50, %v91_v1  ;;  %vm124_vm9 = vcmp.eq.s32.totalorder %v623_v51, %v91_v1 }
  0x9d   :  { %423 = vmatmul.msk.f32.gmra.mxu0 %vm101_vm14, %v549_v53  ;;  %432 = vmatmul.msk.f32.gmra.mxu2 %vm119_vm15, %v549_v53 }
  0x9e   :  { %439 = vmatmul.msk.f32.gmra.mxu1 %vm102_vm0, %v549_v53  ;;  %448 = vmatmul.msk.f32.gmra.mxu3 %vm120_vm1, %v549_v53 }
  0xa3   :  { %v70_v4 = vpop.permute.xlu0 %69 }
  0xa4   :  { %vm109_vm14 = vcmp.eq.s32.totalorder %v620_v50, %v70_v4  ;;  %vm110_vm15 = vcmp.eq.s32.totalorder %v623_v51, %v70_v4 }
  0xa5   :  { %424 = vmatmul.msk.f32.gmra.mxu0 %vm103_vm2, %v549_v53  ;;  %433 = vmatmul.msk.f32.gmra.mxu2 %vm121_vm3, %v549_v53 }
  0xa6   :  { %440 = vmatmul.msk.f32.gmra.mxu1 %vm104_vm4, %v549_v53  ;;  %449 = vmatmul.msk.f32.gmra.mxu3 %vm122_vm5, %v549_v53 }
  0xad   :  { %425 = vmatmul.msk.f32.gmra.mxu0 %vm105_vm6, %v549_v53  ;;  %434 = vmatmul.msk.f32.gmra.mxu2 %vm123_vm7, %v549_v53 }
  0xae   :  { %441 = vmatmul.msk.f32.gmra.mxu1 %vm106_vm8, %v549_v53  ;;  %450 = vmatmul.msk.f32.gmra.mxu3 %vm124_vm9, %v549_v53 }
  0xb5   :  { %426 = vmatmul.msk.f32.gmra.mxu0 %vm107_vm11, %v549_v53  ;;  %435 = vmatmul.msk.f32.gmra.mxu2 %vm125_vm10, %v549_v53 }
  0xb6   :  { %442 = vmatmul.msk.f32.gmra.mxu1 %vm108_vm13, %v549_v53  ;;  %451 = vmatmul.msk.f32.gmra.mxu3 %vm126_vm12, %v549_v53 }
  0xbd   :  { %427 = vmatmul.msk.f32.gmra.mxu0 %vm109_vm14, %v549_v53 }
  0xbe   :  { %443 = vmatmul.msk.f32.gmra.mxu1 %vm110_vm15, %v549_v53 }
 0x100   :  { %v264_v5 = vpop.f32.mrf.mxu2  ;;  %v329_v6 = vpop.f32.mrf.mxu3 }
 0x101   :  { %v330_v7 = vadd.f32 %v329_v6, %v264_v5 }
 0x102   :  { %v240_v8 = vpop.f32.mrf.mxu0 }
 0x103   :  { %361 = vst [vmem:[#allocation5 + $0x40] sm:$0xff] %v330_v7  ;;  %v305_v9 = vpop.f32.mrf.mxu1 }
 0x104   :  { %v306_v10 = vadd.f32 %v305_v9, %v240_v8 }
 0x106   :  { %353 = vst [vmem:[#allocation5] sm:$0xff] %v306_v10 }
 0x108   :  { %v267_v11 = vpop.f32.mrf.mxu2 }
 0x109   :  { %v332_v12 = vpop.f32.mrf.mxu3 }
 0x10a   :  { %v333_v13 = vadd.f32 %v332_v12, %v267_v11  ;;  %v243_v14 = vpop.f32.mrf.mxu0 }
 0x10b   :  { %v308_v15 = vpop.f32.mrf.mxu1 }
 0x10c   :  { %362 = vst [vmem:[#allocation5 + $0x48] sm:$0xff] %v333_v13  ;;  %v309_v16 = vadd.f32 %v308_v15, %v243_v14 }
 0x10e   :  { %354 = vst [vmem:[#allocation5 + $0x8] sm:$0xff] %v309_v16 }
 0x110   :  { %v270_v17 = vpop.f32.mrf.mxu2 }
 0x111   :  { %v335_v18 = vpop.f32.mrf.mxu3 }
 0x112   :  { %v336_v19 = vadd.f32 %v335_v18, %v270_v17  ;;  %v246_v20 = vpop.f32.mrf.mxu0 }
 0x113   :  { %v311_v21 = vpop.f32.mrf.mxu1 }
 0x114   :  { %363 = vst [vmem:[#allocation5 + $0x50] sm:$0xff] %v336_v19  ;;  %v312_v22 = vadd.f32 %v311_v21, %v246_v20 }
 0x116   :  { %355 = vst [vmem:[#allocation5 + $0x10] sm:$0xff] %v312_v22 }
 0x118   :  { %v273_v23 = vpop.f32.mrf.mxu2 }
 0x119   :  { %v338_v24 = vpop.f32.mrf.mxu3 }
 0x11a   :  { %v339_v25 = vadd.f32 %v338_v24, %v273_v23  ;;  %v249_v26 = vpop.f32.mrf.mxu0 }
 0x11b   :  { %v314_v27 = vpop.f32.mrf.mxu1 }
 0x11c   :  { %364 = vst [vmem:[#allocation5 + $0x58] sm:$0xff] %v339_v25  ;;  %v315_v28 = vadd.f32 %v314_v27, %v249_v26 }
 0x11e   :  { %356 = vst [vmem:[#allocation5 + $0x18] sm:$0xff] %v315_v28 }
 0x120   :  { %v276_v29 = vpop.f32.mrf.mxu2 }
 0x121   :  { %v341_v30 = vpop.f32.mrf.mxu3 }
 0x122   :  { %v342_v31 = vadd.f32 %v341_v30, %v276_v29  ;;  %v252_v32 = vpop.f32.mrf.mxu0 }
 0x123   :  { %v317_v33 = vpop.f32.mrf.mxu1 }
 0x124   :  { %365 = vst [vmem:[#allocation5 + $0x60] sm:$0xff] %v342_v31  ;;  %v318_v34 = vadd.f32 %v317_v33, %v252_v32 }
 0x126   :  { %357 = vst [vmem:[#allocation5 + $0x20] sm:$0xff] %v318_v34 }
 0x128   :  { %v279_v35 = vpop.f32.mrf.mxu2 }
 0x129   :  { %v344_v36 = vpop.f32.mrf.mxu3 }
 0x12a   :  { %v345_v37 = vadd.f32 %v344_v36, %v279_v35  ;;  %v255_v38 = vpop.f32.mrf.mxu0 }
 0x12b   :  { %v320_v39 = vpop.f32.mrf.mxu1 }
 0x12c   :  { %366 = vst [vmem:[#allocation5 + $0x68] sm:$0xff] %v345_v37  ;;  %v321_v40 = vadd.f32 %v320_v39, %v255_v38 }
 0x12e   :  { %358 = vst [vmem:[#allocation5 + $0x28] sm:$0xff] %v321_v40 }
 0x130   :  { %v282_v41 = vpop.f32.mrf.mxu2 }
 0x131   :  { %v347_v42 = vpop.f32.mrf.mxu3 }
 0x132   :  { %v348_v43 = vadd.f32 %v347_v42, %v282_v41  ;;  %v258_v44 = vpop.f32.mrf.mxu0 }
 0x133   :  { %v323_v45 = vpop.f32.mrf.mxu1 }
 0x134   :  { %367 = vst [vmem:[#allocation5 + $0x70] sm:$0xff] %v348_v43  ;;  %v324_v46 = vadd.f32 %v323_v45, %v258_v44 }
 0x136   :  { %359 = vst [vmem:[#allocation5 + $0x30] sm:$0xff] %v324_v46 }
 0x138   :  { %v285_v47 = vpop.f32.mrf.mxu2 }
 0x139   :  { %v350_v48 = vpop.f32.mrf.mxu3 }
 0x13a   :  { %v351_v49 = vadd.f32 %v350_v48, %v285_v47  ;;  %v261_v50 = vpop.f32.mrf.mxu0 }
 0x13b   :  { %v326_v51 = vpop.f32.mrf.mxu1 }
 0x13c   :  { %368 = vst [vmem:[#allocation5 + $0x78] sm:$0xff] %v351_v49  ;;  %v327_v52 = vadd.f32 %v326_v51, %v261_v50 }
 0x13e   :  { %360 = vst [vmem:[#allocation5 + $0x38] sm:$0xff] %v327_v52 }
 0x13f   :  { %381 = dma.vmem_to_hbm [thread:$0]  %s374_s20, 2048, %s376_s23, [#allocation4], %s546_s14, %s546_s14, %s547_s15  }
 0x140   :  { %543 = dma.done.wait [#allocation4], 2048  }
 0x141   :  { %544 = vsyncadd [#allocation4], 4294965248 }
 0x142   :  { %386 = vsyncpa [#allocation3], 1 }
 0x143   :  { %387 = vsyncpa [#allocation4], 1 }

</bundles_post_ra>
